<compile_context>
chip_gen: v6e
topology: v6e:2x2x1
jax: 0.10.0
libtpu: 0.0.40
codegen_flags: <defaults>
</compile_context>

<pallas_src>
import functools

import jax
import jax.numpy as jnp
from jax.experimental import pallas as pl
from jax.experimental.pallas import tpu as pltpu

_INV_SQRT2 = 0.7071067811865475


def _round_up(x, m):
    return (x + m - 1) // m * m


def _cdiv(a, b):
    return (a + b - 1) // b


def _tpu_generation():
    """Best-effort TPU generation (5 / 6 / 7); None if unknown."""
    try:
        kind = jax.devices()[0].device_kind.lower()
    except Exception:
        return None
    for gen in (7, 6, 5, 4):
        if f"v{gen}" in kind:
            return gen
    return None


def _default_vmem_limit(gen):
    # v7x has only 64 MiB physical VMEM -> leave headroom; v5e/v6e have 128 MiB.
    if gen == 7:
        return 40 * 1024 * 1024
    if gen == 6:
        return 100 * 1024 * 1024
    if gen == 5:
        return 96 * 1024 * 1024
    return 64 * 1024 * 1024


def _pick_tile_m(M, sublane, gen, tile_m, H, bytes_x, vmem_limit):
    """M-tile size: big enough to amortize weight re-streaming per M tile."""
    if tile_m is not None:
        target = _round_up(tile_m, sublane)
    elif gen == 6:
        target = 1024   # v6e needs ~680 flops/byte (918 TF/s / 1.35 TB/s)
    elif gen == 7:
        target = 512    # v7x threshold ~310 flops/byte
    else:
        target = 512    # v5e threshold ~240 flops/byte (+margin); unknown: safe
    tm = min(target, _round_up(M, sublane))
    tm = max(sublane, _round_up(tm, sublane))

    # Keep acc (f32) + double-buffered x/out tiles well under the VMEM budget.
    def _fixed(t):
        return t * H * 4 + 4 * t * H * bytes_x

    while tm > sublane and _fixed(tm) > (vmem_limit * 6) // 10:
        tm = max(sublane, _round_up(tm // 2, sublane))

    # v7x: M is the only 'parallel' grid axis and there are 2 TensorCores per
    # chip -- prefer >= 2 M tiles so the second core isn't idle.
    if gen == 7 and tile_m is None:
        while _cdiv(M, tm) < 2 and tm > 2 * sublane:
            tm = max(sublane, _round_up(tm // 2, sublane))
    return tm


def _pick_tile_d(D, H, tm, bytes_x, bytes_w, vmem_limit, tile_d):
    """D-chunk size from the VMEM budget; prefers a divisor of D (no padding)."""
    if tile_d is not None:
        cap = tile_d if tile_d >= D else max(128, (tile_d // 128) * 128)
    else:
        # Budget left for weights + h after acc, double-buffered x/out tiles,
        # and ~2 MiB headroom.
        fixed = tm * H * 4 + 4 * tm * H * bytes_x + (2 << 20)
        avail = max(vmem_limit - fixed, 0)
        # Per unit of td: double-buffered W1 + W2 chunks + the f32 h column.
        per_td = 4 * H * bytes_w + 4 * tm
        cap = max(128, (avail // per_td) // 128 * 128)
    if D <= cap:
        return D, D
    td = (cap // 128) * 128
    while td >= 128:
        if D % td == 0:
            return td, D                      # exact divisor: no weight padding
        td -= 128
    # TODO(synk): D has no 128-multiple divisor <= cap; rare fallback pads the
    # weights per call (zero-padded D rows/cols contribute exactly zero).
    td = max(128, (cap // 128) * 128)
    return td, _round_up(D, td)


def _mlp_kernel(x_ref, w1_ref, b1_ref, w2_ref, b2_ref, o_ref, acc_ref):
    j = pl.program_id(1)

    # fc1 chunk: (tm, H) @ (H, td) -> f32, + b1 chunk
    h = jnp.dot(x_ref[...], w1_ref[...], preferred_element_type=jnp.float32)
    h = h + b1_ref[...].astype(jnp.float32)
    # exact erf GELU (matches torch.nn.functional.gelu default)
    h = 0.5 * h * (1.0 + jax.lax.erf(h * _INV_SQRT2))
    # dropout -> identity (eval mode)

    # fc2 partial: (tm, td) @ (td, H), accumulated across D chunks in f32.
    partial = jnp.dot(h.astype(w2_ref.dtype), w2_ref[...],
                      preferred_element_type=jnp.float32)

    @pl.when(j == 0)
    def _():
        acc_ref[...] = partial        # first chunk writes: no zero-init store

    @pl.when(j != 0)
    def _():
        acc_ref[...] += partial

    @pl.when(j == pl.num_programs(1) - 1)
    def _():
        # b2 added exactly once at the final write; dropout -> identity.
        o_ref[...] = (acc_ref[...]
                      + b2_ref[...].astype(jnp.float32)).astype(o_ref.dtype)


@functools.partial(jax.jit,
                   static_argnames=("tile_m", "tile_d", "vmem_limit_bytes"))
def mlp_forward(x, w1, b1, w2, b2, *, tile_m=None, tile_d=None,
                vmem_limit_bytes=None):
    """x: (B, S, H); w1: (H, D); b1: (D,); w2: (D, H); b2: (H,)."""
    B, S, H = x.shape
    H2, D = w1.shape
    assert H2 == H and w2.shape == (D, H) and b1.shape == (D,) and b2.shape == (H,)
    M = B * S

    gen = _tpu_generation()
    vmem_limit = (vmem_limit_bytes if vmem_limit_bytes is not None
                  else _default_vmem_limit(gen))

    bytes_x = jnp.dtype(x.dtype).itemsize
    bytes_w = jnp.dtype(w1.dtype).itemsize
    # dtype-aware sublane minimum (bf16 packs 16 rows per vreg, f32 packs 8)
    sublane = 16 if x.dtype == jnp.bfloat16 else 8

    tm = _pick_tile_m(M, sublane, gen, tile_m, H, bytes_x, vmem_limit)
    Mp = _round_up(M, tm)
    td, Dp = _pick_tile_d(D, H, tm, bytes_x, bytes_w, vmem_limit, tile_d)

    x2d = x.reshape(M, H)
    if Mp != M:
        x2d = jnp.pad(x2d, ((0, Mp - M), (0, 0)))
    if Dp != D:
        # Rare fallback only (see _pick_tile_d); normally td divides D exactly.
        w1 = jnp.pad(w1, ((0, 0), (0, Dp - D)))
        b1 = jnp.pad(b1, ((0, Dp - D),))
        w2 = jnp.pad(w2, ((0, Dp - D), (0, 0)))

    b1_2d = b1.reshape(1, Dp)
    b2_2d = b2.reshape(1, H)

    grid = (Mp // tm, Dp // td)
    num_m_tiles = grid[0]

    cost = pl.CostEstimate(
        flops=4 * M * H * D,
        transcendentals=M * D,
        bytes_accessed=(2 * Mp * H * bytes_x                      # x in + out
                        + num_m_tiles * (2 * H * Dp * bytes_w     # W1+W2 per M tile
                                         + Dp * jnp.dtype(b1.dtype).itemsize)
                        + H * jnp.dtype(b2.dtype).itemsize),
    )

    out2d = pl.pallas_call(
        _mlp_kernel,
        out_shape=jax.ShapeDtypeStruct((Mp, H), x.dtype),
        grid_spec=pltpu.PrefetchScalarGridSpec(
            num_scalar_prefetch=0,
            grid=grid,
            in_specs=[
                pl.BlockSpec((tm, H), lambda i, j: (i, 0)),   # x rows
                pl.BlockSpec((H, td), lambda i, j: (0, j)),   # W1 chunk
                pl.BlockSpec((1, td), lambda i, j: (0, j)),   # b1 chunk
                pl.BlockSpec((td, H), lambda i, j: (j, 0)),   # W2 chunk
                pl.BlockSpec((1, H), lambda i, j: (0, 0)),    # b2
            ],
            out_specs=pl.BlockSpec((tm, H), lambda i, j: (i, 0)),
            scratch_shapes=[pltpu.VMEM((tm, H), jnp.float32)],
        ),
        compiler_params=pltpu.CompilerParams(
            dimension_semantics=("parallel", "arbitrary"),
            vmem_limit_bytes=vmem_limit,
        ),
        cost_estimate=cost,
    )(x2d, w1, b1_2d, w2, b2_2d)

    if Mp != M:
        out2d = out2d[:M]
    return out2d.reshape(B, S, H)


def init_mlp_params(key, hidden_size, mlp_dim, dtype=jnp.float32):
    """Deterministic init matching the PyTorch module's _init_weights."""
    k1, k2, k3, k4 = jax.random.split(key, 4)
    lim1 = (6.0 / (hidden_size + mlp_dim)) ** 0.5
    lim2 = (6.0 / (mlp_dim + hidden_size)) ** 0.5
    # Stored already transposed to (in_dim, out_dim) for the kernel.
    w1 = jax.random.uniform(k1, (hidden_size, mlp_dim), dtype, -lim1, lim1)
    w2 = jax.random.uniform(k2, (mlp_dim, hidden_size), dtype, -lim2, lim2)
    b1 = 1e-6 * jax.random.normal(k3, (mlp_dim,), dtype)
    b2 = 1e-6 * jax.random.normal(k4, (hidden_size,), dtype)
    return w1, b1, w2, b2


def _reference(x, w1, b1, w2, b2):
    h = x @ w1 + b1
    h = 0.5 * h * (1.0 + jax.lax.erf(h * _INV_SQRT2))
    return h @ w2 + b2


if __name__ == "__main__":
    key = jax.random.PRNGKey(0)

    def check(out, ref, name, tol):
        assert jnp.allclose(out, ref, atol=tol, rtol=tol), f"{name} mismatch"

    # Case 1: small canonical shapes (single D chunk, single M tile).
    batch, seq, hidden, mlp_dim = 2, 8, 32, 64
    kx, kp, key = jax.random.split(key, 3)
    x = jax.random.normal(kx, (batch, seq, hidden), jnp.float32)
    w1, b1, w2, b2 = init_mlp_params(kp, hidden, mlp_dim)
    out = jax.block_until_ready(mlp_forward(x, w1, b1, w2, b2))
    ref = _reference(x, w1, b1, w2, b2)
    assert out.shape == (batch, seq, hidden)
    check(out, ref, "case1", 1e-5)

    # Case 2: M not divisible by the tile (row padding) + D split across 3
    # chunks (f32 accumulator / b2-added-once path; td divides D -> no weight
    # padding occurs).
    batch, seq, hidden, mlp_dim = 3, 5, 128, 384
    kx, kp, key = jax.random.split(key, 3)
    x = jax.random.normal(kx, (batch, seq, hidden), jnp.float32)
    w1, b1, w2, b2 = init_mlp_params(kp, hidden, mlp_dim)
    out = jax.block_until_ready(mlp_forward(x, w1, b1, w2, b2, tile_d=128))
    ref = _reference(x, w1, b1, w2, b2)
    check(out, ref, "case2", 1e-4)

    # Case 3: multiple M tiles (parallel axis) x multiple D chunks.
    batch, seq, hidden, mlp_dim = 4, 300, 128, 512
    kx, kp, key = jax.random.split(key, 3)
    x = jax.random.normal(kx, (batch, seq, hidden), jnp.float32)
    w1, b1, w2, b2 = init_mlp_params(kp, hidden, mlp_dim)
    out = jax.block_until_ready(
        mlp_forward(x, w1, b1, w2, b2, tile_m=256, tile_d=128))
    ref = _reference(x, w1, b1, w2, b2)
    check(out, ref, "case3", 2e-4)

    # Case 4: fully automatic tiling (generation-aware tm, VMEM-derived td).
    out = jax.block_until_ready(mlp_forward(x, w1, b1, w2, b2))
    check(out, ref, "case4", 2e-4)

    print("KERNEL_OK")
</pallas_src>

<mosaic_0001>
module attributes {stable_mosaic.version = 11 : i64} {
  func.func @_mlp_kernel(%arg0: i32, %arg1: i32, %arg2: memref<16x32xf32, #tpu.memory_space<vmem>>, %arg3: memref<32x64xf32, #tpu.memory_space<vmem>>, %arg4: memref<1x64xf32, #tpu.memory_space<vmem>>, %arg5: memref<64x32xf32, #tpu.memory_space<vmem>>, %arg6: memref<1x32xf32, #tpu.memory_space<vmem>>, %arg7: memref<16x32xf32, #tpu.memory_space<vmem>>, %arg8: memref<16x32xf32, #tpu.memory_space<vmem>>) attributes {dimension_semantics = [#tpu.dimension_semantics<parallel>, #tpu.dimension_semantics<arbitrary>], iteration_bounds = array<i64: 1, 1>, scalar_prefetch = 0 : i64, scratch_operands = 1 : i64, tpu.core_type = #tpu.core_type<tc>, window_params = [{transform_indices = @transform_0, window_bounds = array<i64: 16, 32>}, {transform_indices = @transform_1, window_bounds = array<i64: 32, 64>}, {transform_indices = @transform_2, window_bounds = array<i64: 1, 64>}, {transform_indices = @transform_3, window_bounds = array<i64: 64, 32>}, {pipeline_mode = #tpu.pipeline_mode<synchronous>, transform_indices = @transform_4, window_bounds = array<i64: 1, 32>}, {transform_indices = @transform_5, window_bounds = array<i64: 16, 32>}]} {
    %c0 = arith.constant 0 : index
    %c0_0 = arith.constant 0 : index
    %0 = vector.load %arg2[%c0, %c0_0] : memref<16x32xf32, #tpu.memory_space<vmem>>, vector<16x32xf32>
    %c0_1 = arith.constant 0 : index
    %c0_2 = arith.constant 0 : index
    %1 = vector.load %arg3[%c0_1, %c0_2] : memref<32x64xf32, #tpu.memory_space<vmem>>, vector<32x64xf32>
    %cst = arith.constant dense<0.000000e+00> : vector<16x64xf32>
    %2 = tpu.matmul %0, %1, %cst {dimension_numbers = #tpu.dot_dimension_numbers<[1], [0], [0], [1], [0, 0, 1, 1], [], []>} : vector<16x32xf32>, vector<32x64xf32>, vector<16x64xf32> -> vector<16x64xf32>
    %c0_3 = arith.constant 0 : index
    %c0_4 = arith.constant 0 : index
    %3 = vector.load %arg4[%c0_3, %c0_4] : memref<1x64xf32, #tpu.memory_space<vmem>>, vector<1x64xf32>
    %4 = vector.broadcast %3 : vector<1x64xf32> to vector<16x64xf32>
    %5 = arith.addf %2, %4 : vector<16x64xf32>
    %cst_5 = arith.constant 5.000000e-01 : f32
    %6 = vector.broadcast %cst_5 : f32 to vector<16x64xf32>
    %7 = arith.mulf %6, %5 : vector<16x64xf32>
    %cst_6 = arith.constant 0.707106769 : f32
    %8 = vector.broadcast %cst_6 : f32 to vector<16x64xf32>
    %9 = arith.mulf %5, %8 : vector<16x64xf32>
    %10 = math.erf %9 : vector<16x64xf32>
    %cst_7 = arith.constant 1.000000e+00 : f32
    %11 = vector.broadcast %cst_7 : f32 to vector<16x64xf32>
    %12 = arith.addf %11, %10 : vector<16x64xf32>
    %13 = arith.mulf %7, %12 : vector<16x64xf32>
    %c0_8 = arith.constant 0 : index
    %c0_9 = arith.constant 0 : index
    %14 = vector.load %arg5[%c0_8, %c0_9] : memref<64x32xf32, #tpu.memory_space<vmem>>, vector<64x32xf32>
    %cst_10 = arith.constant dense<0.000000e+00> : vector<16x32xf32>
    %15 = tpu.matmul %13, %14, %cst_10 {dimension_numbers = #tpu.dot_dimension_numbers<[1], [0], [0], [1], [0, 0, 1, 1], [], []>} : vector<16x64xf32>, vector<64x32xf32>, vector<16x32xf32> -> vector<16x32xf32>
    %c0_i32 = arith.constant 0 : i32
    %16 = arith.cmpi eq, %arg1, %c0_i32 : i32
    %17 = arith.extui %16 : i1 to i32
    %c0_i32_11 = arith.constant 0 : i32
    %18 = arith.cmpi ne, %17, %c0_i32_11 : i32
    scf.if %18 {
      %c0_16 = arith.constant 0 : index
      %c0_17 = arith.constant 0 : index
      %25 = vector.load %arg8[%c0_16, %c0_17] : memref<16x32xf32, #tpu.memory_space<vmem>>, vector<16x32xf32>
      tpu.vector_store %arg8[%c0_16, %c0_17], %15 {strides = array<i32>} : memref<16x32xf32, #tpu.memory_space<vmem>>, vector<16x32xf32>,
    } else {
    }
    %c0_i32_12 = arith.constant 0 : i32
    %19 = arith.cmpi ne, %arg1, %c0_i32_12 : i32
    %20 = arith.extui %19 : i1 to i32
    %c0_i32_13 = arith.constant 0 : i32
    %21 = arith.cmpi ne, %20, %c0_i32_13 : i32
    scf.if %21 {
      %c0_16 = arith.constant 0 : index
      %c0_17 = arith.constant 0 : index
      %25 = vector.load %arg8[%c0_16, %c0_17] : memref<16x32xf32, #tpu.memory_space<vmem>>, vector<16x32xf32>
      %26 = arith.addf %25, %15 : vector<16x32xf32>
      %c0_18 = arith.constant 0 : index
      %c0_19 = arith.constant 0 : index
      %27 = vector.load %arg8[%c0_18, %c0_19] : memref<16x32xf32, #tpu.memory_space<vmem>>, vector<16x32xf32>
      tpu.vector_store %arg8[%c0_18, %c0_19], %26 {strides = array<i32>} : memref<16x32xf32, #tpu.memory_space<vmem>>, vector<16x32xf32>,
    } else {
    }
    %c0_i32_14 = arith.constant 0 : i32
    %22 = arith.cmpi eq, %arg1, %c0_i32_14 : i32
    %23 = arith.extui %22 : i1 to i32
    %c0_i32_15 = arith.constant 0 : i32
    %24 = arith.cmpi ne, %23, %c0_i32_15 : i32
    scf.if %24 {
      %c0_16 = arith.constant 0 : index
      %c0_17 = arith.constant 0 : index
      %25 = vector.load %arg8[%c0_16, %c0_17] : memref<16x32xf32, #tpu.memory_space<vmem>>, vector<16x32xf32>
      %c0_18 = arith.constant 0 : index
      %c0_19 = arith.constant 0 : index
      %26 = vector.load %arg6[%c0_18, %c0_19] : memref<1x32xf32, #tpu.memory_space<vmem>>, vector<1x32xf32>
      %27 = vector.broadcast %26 : vector<1x32xf32> to vector<16x32xf32>
      %28 = arith.addf %25, %27 : vector<16x32xf32>
      %c0_20 = arith.constant 0 : index
      %c0_21 = arith.constant 0 : index
      %29 = vector.load %arg7[%c0_20, %c0_21] : memref<16x32xf32, #tpu.memory_space<vmem>>, vector<16x32xf32>
      tpu.vector_store %arg7[%c0_20, %c0_21], %28 {strides = array<i32>} : memref<16x32xf32, #tpu.memory_space<vmem>>, vector<16x32xf32>,
    } else {
    }
    return
  }
  func.func @transform_0(%arg0: i32, %arg1: i32) -> (i32, i32) {
    %c0_i32 = arith.constant 0 : i32
    %c0_i32_0 = arith.constant 0 : i32
    return %arg0, %c0_i32 : i32, i32
  }
  func.func @transform_1(%arg0: i32, %arg1: i32) -> (i32, i32) {
    %c0_i32 = arith.constant 0 : i32
    %c0_i32_0 = arith.constant 0 : i32
    return %c0_i32, %arg1 : i32, i32
  }
  func.func @transform_2(%arg0: i32, %arg1: i32) -> (i32, i32) {
    %c0_i32 = arith.constant 0 : i32
    %c0_i32_0 = arith.constant 0 : i32
    return %c0_i32, %arg1 : i32, i32
  }
  func.func @transform_3(%arg0: i32, %arg1: i32) -> (i32, i32) {
    %c0_i32 = arith.constant 0 : i32
    %c0_i32_0 = arith.constant 0 : i32
    return %arg1, %c0_i32 : i32, i32
  }
  func.func @transform_4(%arg0: i32, %arg1: i32) -> (i32, i32) {
    %c0_i32 = arith.constant 0 : i32
    %c0_i32_0 = arith.constant 0 : i32
    %c0_i32_1 = arith.constant 0 : i32
    return %c0_i32, %c0_i32_0 : i32, i32
  }
  func.func @transform_5(%arg0: i32, %arg1: i32) -> (i32, i32) {
    %c0_i32 = arith.constant 0 : i32
    %c0_i32_0 = arith.constant 0 : i32
    return %arg0, %c0_i32 : i32, i32
  }
}

</mosaic_0001>

<bundles_post_ra>
// kernel: mlp_forward.1
= control target key start
LH: loop header
LB: loop body
LE: loop exit
PB: predicated region body
PF: predicated region fallthrough
CT: control target
= control target key end

     0   :  { %vm34_vm0 = vcmask 261120   ;;  %s435_s0 = inlined_call_operand.vmem [shape: f32[16,32], index: 0, kind: input, shape index: {}]   ;;  %s436_s1 = inlined_call_operand.vmem [shape: f32[32,64], index: 1, kind: input, shape index: {}]   ;;  %s437_s2 = inlined_call_operand.vmem [shape: f32[1,64], index: 2, kind: input, shape index: {}]   ;;  %s438_s3 = inlined_call_operand.vmem [shape: f32[64,32], index: 3, kind: input, shape index: {}]   ;;  %s439_s4 = inlined_call_operand.vmem [shape: f32[1,32], index: 4, kind: input, shape index: {}]   ;;  %s440_s5 = inlined_call_operand.hbm [shape: f32[16,32], index: 5, kind: output, shape index: {}]  }
   0x1   :  { %v26_v0 = vld [vmem:[%s436_s1 + $0x18] sm:$0xff]  ;;  %v25_v1 = vld [vmem:[%s436_s1 + $0x10] sm:$0xff]  ;;  %v21_v2 = vld [vmem:[%s435_s0] sm:$0xff] }
   0x2   :  { %286 = vmatprep.subr.mxu0 %v26_v0  ;;  %v24_v3 = vld [vmem:[%s436_s1 + $0x8] sm:$0xff]  ;;  %294 = vmatprep.mubr.msk.f32.mxu0 %vm34_vm0, %v21_v2 }
   0x3   :  { %287 = vmatpush3.msra.mxu0 %v26_v0 }
   0x4   :  { %10 = vsyncpa [#allocation4], 0  ;;  %288 = vmatprep.subr.mxu0 %v25_v1  ;;  %v23_v4 = vld [vmem:[%s436_s1] sm:$0xff]  ;;  %v22_v5 = vld [vmem:[%s435_s0 + $0x8] sm:$0xff]  ;;  %vm134_vm1 = vcmask 523264   ;;  %s345_s21 = smov [#allocation3]  }
   0x5   :  { %289 = vmatpush3.msra.mxu0 %v25_v1  ;;  %v133_v6 = vld [vmem:[%s438_s3 + $0x38] sm:$0xff]  ;;  %v132_v7 = vld [vmem:[%s438_s3 + $0x30] sm:$0xff]  ;;  %v131_v8 = vld [vmem:[%s438_s3 + $0x28] sm:$0xff]  ;;  %s253_s22 = sshll.u32 %s345_s21, 4  ;;  %s254_s22 = int_to_ptr.vmem [resolvable:$true] %s253_s22 }
   0x6   :  { %290 = vmatprep.subr.mxu0 %v24_v3  ;;  %297 = vmatprep.subr.mxu1 %v133_v6  ;;  %v130_v9 = vld [vmem:[%s438_s3 + $0x20] sm:$0xff]  ;;  %v129_v10 = vld [vmem:[%s438_s3 + $0x18] sm:$0xff]  ;;  %v128_v11 = vld [vmem:[%s438_s3 + $0x10] sm:$0xff]  ;;  %s323_s23 = scalar_lea.vmem %s254_s22, 256  ;;  %p328_p1 = scmp.lt.s32.totalorder %s254_s22, %s254_s22 }
   0x7   :  { %291 = vmatpush3.msra.mxu0 %v24_v3  ;;  %298 = vmatpush3.msra.mxu1 %v133_v6  ;;  %v127_v12 = vld [vmem:[%s438_s3 + $0x8] sm:$0xff]  ;;  %v126_v13 = vld [vmem:[%s438_s3] sm:$0xff]  ;;  %p324_p0 = scmp.ne.s32.totalorder %s254_s22, %s323_s23  ;;  %p329_p2 = scmp.lt.s32.totalorder %s323_s23, %s323_s23 }
   0x8   :  { %292 = vmatprep.subr.mxu0 %v23_v4  ;;  %299 = vmatprep.subr.mxu1 %v132_v7  ;;  %v264_v14 = vld [vmem:[%s437_s2] ss:$0 sm:$0xff] }
   0x9   :  { %293 = vmatpush3.msra.mxu0 %v23_v4  ;;  %300 = vmatpush3.msra.mxu1 %v132_v7  ;;  %v269_v31 = vld [vmem:[%s439_s4] ss:$0 sm:$0xff]  ;;  %p330_p3 = por %p329_p2, %p328_p1 }
   0xa   :  { %295 = vmatmul.mubr.msk.f32.vlgmr.msra.gmra.mxu0 %vm34_vm0, %v22_v5  ;;  %301 = vmatprep.subr.mxu1 %v131_v8 }
   0xb   :  { %302 = vmatpush3.msra.mxu1 %v131_v8  ;;  %p331_p4 = pnand %p330_p3, %p324_p0 }
   0xc   :  { %303 = vmatprep.subr.mxu1 %v130_v9 }
   0xd   :  { %304 = vmatpush3.msra.mxu1 %v130_v9 }
   0xe   :  { %305 = vmatprep.subr.mxu1 %v129_v10 }
   0xf   :  { %306 = vmatpush3.msra.mxu1 %v129_v10 }
  0x10   :  { %307 = vmatprep.subr.mxu1 %v128_v11 }
  0x11   :  { %308 = vmatpush3.msra.mxu1 %v128_v11 }
  0x12   :  { %309 = vmatprep.subr.mxu1 %v127_v12 }
  0x13   :  { %310 = vmatpush3.msra.mxu1 %v127_v12 }
  0x14   :  { %311 = vmatprep.subr.mxu1 %v126_v13 }
  0x15   :  { %312 = vmatpush3.msra.mxu1 %v126_v13 }
  0xca   :  { %v296_v15 = vpop.f32.mrf.mxu0 }
  0xcb   :  { %v113_v16 = vadd.f32 %v296_v15, %v264_v14 }
  0xcc   :  { %v107_v17 = vpop.f32.mrf.mxu0 }
  0xcd   :  { %v119_v18 = vmul.f32 0.70710677, %v113_v16  ;;  %v108_v19 = vadd.f32 %v264_v14, %v107_v17  ;;  %v117_v26 = vmul.f32 0.5, %v113_v16 }
  0xcf   :  { %319 = verf.f32 %v119_v18  ;;  %v118_v20 = vmul.f32 0.70710677, %v108_v19  ;;  %v116_v24 = vmul.f32 0.5, %v108_v19 }
  0xd1   :  { %321 = verf.f32 %v118_v20 }
  0xdc   :  { %v320_v21 = vpop.eup %319 }
  0xdd   :  { %v123_v23 = vadd.f32 1.0, %v320_v21 }
  0xde   :  { %v322_v22 = vpop.eup %321 }
  0xdf   :  { %v122_v25 = vadd.f32 1.0, %v322_v22  ;;  %v125_v28 = vmul.f32 %v123_v23, %v117_v26 }
  0xe1   :  { %v124_v27 = vmul.f32 %v122_v25, %v116_v24 }
  0xe3   :  { %313 = vmatprep.mubr.msk.f32.mxu1 %vm134_vm1, %v124_v27 }
  0xe4   :  { %314 = vmatmul.mubr.msk.f32.vlgmr.msra.gmra.mxu1 %vm134_vm1, %v125_v28 }
 0x1a4   :  { %v315_v29 = vpop.f32.mrf.mxu1 }
 0x1a5   :  { %221 = vst.msk [vmem:[#allocation2 + $0x8] sm:$0xff] %vm34_vm0, %v315_v29 }
 0x1a6   :  { %v207_v30 = vpop.f32.mrf.mxu1 }
 0x1a7   :  { %220 = vst.msk [vmem:[#allocation2] sm:$0xff] %vm34_vm0, %v207_v30 }
 0x1ac   :  { %v236_v32 = vld [vmem:[#allocation2 + $0x8] sm:$0xff] }
 0x1ad   :  { %v245_v33 = vadd.f32 %v269_v31, %v236_v32 }
 0x1ae   :  { %v235_v34 = vld [vmem:[#allocation2] sm:$0xff] }
 0x1af   :  { %v244_v35 = vadd.f32 %v269_v31, %v235_v34  ;;  %247 = vst.msk [vmem:[#allocation3 + $0x8] sm:$0xff] %vm34_vm0, %v245_v33 }
 0x1b1   :  { %246 = vst.msk [vmem:[#allocation3] sm:$0xff] %vm34_vm0, %v244_v35 }
 0x1b2   :  { %334 = shalt.err (!%p331_p4)
}
 0x1b3   :  { %s346_s24 = smov 128   ;;  %s347_s4 = smov 8  }
 0x1b4   :  { %259 = dma.vmem_to_hbm [thread:$0]  %s254_s22, 256, %s440_s5, [#allocation4], %s346_s24, %s346_s24, %s347_s4  }
 0x1b5   :  { %343 = dma.done.wait [#allocation4], 256  }
 0x1b6   :  { %344 = vsyncadd [#allocation4], 4294967040 }
 0x1b7   :  { %263 = vsyncpa [#allocation4], 1 }

</bundles_post_ra>
